<compile_context>
chip_gen: v6e
topology: v6e:2x2x1
jax: 0.10.0
libtpu: 0.0.40
codegen_flags: <defaults>
</compile_context>

<pallas_src>
import jax
import jax.numpy as jnp
from jax.experimental import pallas as pl
from jax.experimental.pallas import tpu as pltpu

N_STATES = 5
# TODO(synk): N_ACTIONS = len(env.Action) in the original; env is unavailable,
# use a small fixed action set.
N_ACTIONS = 4
HIDDEN = 128
OUT_PAD = 128   # N_ACTIONS padded to full lane width for lane-dense stores


def _round_up(n, m):
    return (n + m - 1) // m * m


def mlp_kernel(x_ref, w_ref, s_ref, o_ref):
    x = x_ref[...]                                   # (tm, N_STATES) f32
    # Small f32 slab: w1 rows + biases (all within one (8,128) VMEM tile).
    w1 = s_ref[0:N_STATES, :]                        # (5, 128)
    b1 = s_ref[N_STATES:N_STATES + 1, :]             # (1, 128)
    b2 = s_ref[N_STATES + 1:N_STATES + 2, :]
    b3 = s_ref[N_STATES + 2:N_STATES + 3, :]

    # fc1 + relu on the VPU: 5 lane-broadcast FMAs in full f32 (no K-pad, no
    # bf16 rounding of x, no MXU fill latency for a K=5 matmul).
    h = b1 + x[:, 0:1] * w1[0:1, :]
    for k in range(1, N_STATES):
        h = h + x[:, k:k + 1] * w1[k:k + 1, :]
    h = jnp.maximum(h, 0.0)

    # fc2 + relu on the MXU: bf16 operands, f32 accumulation, f32 epilogue.
    w2 = w_ref[0:HIDDEN, :]                          # (128, 128) bf16
    w3 = w_ref[HIDDEN:2 * HIDDEN, :]                 # (128, 128) bf16, pad cols 0
    h = jnp.dot(h.astype(jnp.bfloat16), w2, preferred_element_type=jnp.float32)
    h = jnp.maximum(h + b2, 0.0)

    # Output head: lane-dense 128-wide padded block -> unmasked full-lane vst.
    o_ref[...] = jnp.dot(h.astype(jnp.bfloat16), w3,
                         preferred_element_type=jnp.float32) + b3


def net_forward(x, w_slab, s_slab, *, block_b=256):
    """x: (B, N_STATES) f32 -> (B, N_ACTIONS) f32."""
    B = x.shape[0]
    # Batch tile: up to block_b rows, 8-row aligned (sublane multiple).
    tm = min(block_b, _round_up(B, 8))
    Bp = _round_up(B, tm)
    x_in = x
    if Bp != B:
        x_in = jnp.zeros((Bp, N_STATES), x.dtype).at[:B, :].set(x)

    out = pl.pallas_call(
        mlp_kernel,
        out_shape=jax.ShapeDtypeStruct((Bp, OUT_PAD), jnp.float32),
        grid=(Bp // tm,),
        in_specs=[
            # Only x streams over the batch grid; weights/biases are
            # VMEM-resident (constant index_map) across all batch tiles.
            pl.BlockSpec((tm, N_STATES), lambda i: (i, 0)),
            pl.BlockSpec(w_slab.shape, lambda i: (0, 0)),
            pl.BlockSpec(s_slab.shape, lambda i: (0, 0)),
        ],
        out_specs=pl.BlockSpec((tm, OUT_PAD), lambda i: (i, 0)),
        compiler_params=pltpu.CompilerParams(
            dimension_semantics=("parallel",)),
    )(x_in, w_slab, s_slab)
    # Pad rows / pad columns (w3/b3) are exactly zero; slice them away.
    return out[:B, :N_ACTIONS]


def init_params(key):
    """Mirror the PyTorch module: weights ~ Normal(0, 0.1); biases use the
    default nn.Linear init Uniform(-1/sqrt(fan_in), 1/sqrt(fan_in))."""
    ks = jax.random.split(key, 6)

    def linear(kw, kb, fan_in, fan_out):
        # stored transposed: (in, out) so the kernel computes x @ W
        w = 0.1 * jax.random.normal(kw, (fan_in, fan_out), dtype=jnp.float32)
        bound = 1.0 / jnp.sqrt(jnp.float32(fan_in))
        b = jax.random.uniform(kb, (1, fan_out), dtype=jnp.float32,
                               minval=-bound, maxval=bound)
        return w, b

    w1, b1 = linear(ks[0], ks[1], N_STATES, HIDDEN)
    w2, b2 = linear(ks[2], ks[3], HIDDEN, HIDDEN)
    w3, b3 = linear(ks[4], ks[5], HIDDEN, N_ACTIONS)
    return (w1, b1, w2, b2, w3, b3)


def pack_params(params):
    """Pack into one bf16 MXU-weight slab and one small f32 slab (2 DMAs)."""
    w1, b1, w2, b2, w3, b3 = params
    w3p = jnp.zeros((HIDDEN, OUT_PAD), jnp.float32).at[:, :N_ACTIONS].set(w3)
    w_slab = jnp.concatenate([w2, w3p], axis=0).astype(jnp.bfloat16)  # (256,128)
    b3p = jnp.zeros((1, OUT_PAD), jnp.float32).at[:, :N_ACTIONS].set(b3)
    s_slab = jnp.concatenate([w1, b1, b2, b3p], axis=0)               # (8,128) f32
    return w_slab, s_slab


def reference_forward(x, params):
    """Pure-JAX reference emulating the kernel's numerics: f32 fc1 (VPU path),
    bf16-rounded MXU operands for fc2/out, f32 accumulation and epilogues."""
    w1, b1, w2, b2, w3, b3 = params
    f = lambda a: a.astype(jnp.bfloat16).astype(jnp.float32)
    hp = jax.lax.Precision.HIGHEST
    h = jnp.maximum(jnp.dot(x, w1, precision=hp) + b1, 0.0)
    h = jnp.maximum(jnp.dot(f(h), f(w2), precision=hp) + b2, 0.0)
    return jnp.dot(f(h), f(w3), precision=hp) + b3


if __name__ == "__main__":
    key = jax.random.PRNGKey(0)
    k_param, k_x1, k_x2 = jax.random.split(key, 3)

    params = init_params(k_param)
    w_slab, s_slab = pack_params(params)

    fwd = jax.jit(net_forward)

    # Small acting-style batch (single 8-row tile, grid of 1).
    B = 8
    x = jax.random.normal(k_x1, (B, N_STATES), dtype=jnp.float32)
    out = jax.block_until_ready(fwd(x, w_slab, s_slab))
    ref = reference_forward(x, params)
    assert out.shape == (B, N_ACTIONS)
    assert jnp.allclose(out, ref, atol=1e-2, rtol=1e-2), (
        float(jnp.max(jnp.abs(out - ref))))

    # Larger evaluation-style batch: exercises the 256-row batch tiles, the
    # multi-step "parallel" grid and the batch padding path.
    B2 = 300
    x2 = jax.random.normal(k_x2, (B2, N_STATES), dtype=jnp.float32)
    out2 = jax.block_until_ready(fwd(x2, w_slab, s_slab))
    ref2 = reference_forward(x2, params)
    assert out2.shape == (B2, N_ACTIONS)
    assert jnp.allclose(out2, ref2, atol=1e-2, rtol=1e-2), (
        float(jnp.max(jnp.abs(out2 - ref2))))

    print("KERNEL_OK")
</pallas_src>

<mosaic_0001>
module attributes {stable_mosaic.version = 11 : i64} {
  func.func @mlp_kernel(%arg0: i32, %arg1: memref<8x5xf32, #tpu.memory_space<vmem>>, %arg2: memref<256x128xbf16, #tpu.memory_space<vmem>>, %arg3: memref<8x128xf32, #tpu.memory_space<vmem>>, %arg4: memref<8x128xf32, #tpu.memory_space<vmem>>) attributes {dimension_semantics = [#tpu.dimension_semantics<parallel>], iteration_bounds = array<i64: 1>, scalar_prefetch = 0 : i64, scratch_operands = 0 : i64, tpu.core_type = #tpu.core_type<tc>, window_params = [{transform_indices = @transform_0, window_bounds = array<i64: 8, 5>}, {pipeline_mode = #tpu.pipeline_mode<synchronous>, transform_indices = @transform_1, window_bounds = array<i64: 256, 128>}, {pipeline_mode = #tpu.pipeline_mode<synchronous>, transform_indices = @transform_2, window_bounds = array<i64: 8, 128>}, {transform_indices = @transform_3, window_bounds = array<i64: 8, 128>}]} {
    %c0 = arith.constant 0 : index
    %c0_0 = arith.constant 0 : index
    %0 = vector.load %arg1[%c0, %c0_0] : memref<8x5xf32, #tpu.memory_space<vmem>>, vector<8x5xf32>
    %c0_1 = arith.constant 0 : index
    %c0_2 = arith.constant 0 : index
    %1 = vector.load %arg3[%c0_1, %c0_2] : memref<8x128xf32, #tpu.memory_space<vmem>>, vector<5x128xf32>
    %c5 = arith.constant 5 : index
    %c0_3 = arith.constant 0 : index
    %2 = vector.load %arg3[%c5, %c0_3] : memref<8x128xf32, #tpu.memory_space<vmem>>, vector<1x128xf32>
    %c6 = arith.constant 6 : index
    %c0_4 = arith.constant 0 : index
    %3 = vector.load %arg3[%c6, %c0_4] : memref<8x128xf32, #tpu.memory_space<vmem>>, vector<1x128xf32>
    %c7 = arith.constant 7 : index
    %c0_5 = arith.constant 0 : index
    %4 = vector.load %arg3[%c7, %c0_5] : memref<8x128xf32, #tpu.memory_space<vmem>>, vector<1x128xf32>
    %5 = vector.extract_strided_slice %0 {offsets = [0, 0], sizes = [8, 1], strides = [1, 1]} : vector<8x5xf32> to vector<8x1xf32>
    %6 = vector.extract_strided_slice %1 {offsets = [0, 0], sizes = [1, 128], strides = [1, 1]} : vector<5x128xf32> to vector<1x128xf32>
    %7 = vector.broadcast %5 : vector<8x1xf32> to vector<8x128xf32>
    %8 = vector.broadcast %6 : vector<1x128xf32> to vector<8x128xf32>
    %9 = arith.mulf %7, %8 : vector<8x128xf32>
    %10 = vector.broadcast %2 : vector<1x128xf32> to vector<8x128xf32>
    %11 = arith.addf %10, %9 : vector<8x128xf32>
    %12 = vector.extract_strided_slice %0 {offsets = [0, 1], sizes = [8, 1], strides = [1, 1]} : vector<8x5xf32> to vector<8x1xf32>
    %13 = vector.extract_strided_slice %1 {offsets = [1, 0], sizes = [1, 128], strides = [1, 1]} : vector<5x128xf32> to vector<1x128xf32>
    %14 = vector.broadcast %12 : vector<8x1xf32> to vector<8x128xf32>
    %15 = vector.broadcast %13 : vector<1x128xf32> to vector<8x128xf32>
    %16 = arith.mulf %14, %15 : vector<8x128xf32>
    %17 = arith.addf %11, %16 : vector<8x128xf32>
    %18 = vector.extract_strided_slice %0 {offsets = [0, 2], sizes = [8, 1], strides = [1, 1]} : vector<8x5xf32> to vector<8x1xf32>
    %19 = vector.extract_strided_slice %1 {offsets = [2, 0], sizes = [1, 128], strides = [1, 1]} : vector<5x128xf32> to vector<1x128xf32>
    %20 = vector.broadcast %18 : vector<8x1xf32> to vector<8x128xf32>
    %21 = vector.broadcast %19 : vector<1x128xf32> to vector<8x128xf32>
    %22 = arith.mulf %20, %21 : vector<8x128xf32>
    %23 = arith.addf %17, %22 : vector<8x128xf32>
    %24 = vector.extract_strided_slice %0 {offsets = [0, 3], sizes = [8, 1], strides = [1, 1]} : vector<8x5xf32> to vector<8x1xf32>
    %25 = vector.extract_strided_slice %1 {offsets = [3, 0], sizes = [1, 128], strides = [1, 1]} : vector<5x128xf32> to vector<1x128xf32>
    %26 = vector.broadcast %24 : vector<8x1xf32> to vector<8x128xf32>
    %27 = vector.broadcast %25 : vector<1x128xf32> to vector<8x128xf32>
    %28 = arith.mulf %26, %27 : vector<8x128xf32>
    %29 = arith.addf %23, %28 : vector<8x128xf32>
    %30 = vector.extract_strided_slice %0 {offsets = [0, 4], sizes = [8, 1], strides = [1, 1]} : vector<8x5xf32> to vector<8x1xf32>
    %31 = vector.extract_strided_slice %1 {offsets = [4, 0], sizes = [1, 128], strides = [1, 1]} : vector<5x128xf32> to vector<1x128xf32>
    %32 = vector.broadcast %30 : vector<8x1xf32> to vector<8x128xf32>
    %33 = vector.broadcast %31 : vector<1x128xf32> to vector<8x128xf32>
    %34 = arith.mulf %32, %33 : vector<8x128xf32>
    %35 = arith.addf %29, %34 : vector<8x128xf32>
    %cst = arith.constant 0.000000e+00 : f32
    %36 = vector.broadcast %cst : f32 to vector<8x128xf32>
    %37 = arith.maximumf %35, %36 : vector<8x128xf32>
    %c0_6 = arith.constant 0 : index
    %c0_7 = arith.constant 0 : index
    %38 = vector.load %arg2[%c0_6, %c0_7] : memref<256x128xbf16, #tpu.memory_space<vmem>>, vector<128x128xbf16>
    %c128 = arith.constant 128 : index
    %c0_8 = arith.constant 0 : index
    %39 = vector.load %arg2[%c128, %c0_8] : memref<256x128xbf16, #tpu.memory_space<vmem>>, vector<128x128xbf16>
    %40 = arith.truncf %37 : vector<8x128xf32> to vector<8x128xbf16>
    %cst_9 = arith.constant dense<0.000000e+00> : vector<8x128xf32>
    %41 = tpu.matmul %40, %38, %cst_9 {dimension_numbers = #tpu.dot_dimension_numbers<[1], [0], [0], [1], [0, 0, 1, 1], [], []>} : vector<8x128xbf16>, vector<128x128xbf16>, vector<8x128xf32> -> vector<8x128xf32>
    %42 = vector.broadcast %3 : vector<1x128xf32> to vector<8x128xf32>
    %43 = arith.addf %41, %42 : vector<8x128xf32>
    %cst_10 = arith.constant 0.000000e+00 : f32
    %44 = vector.broadcast %cst_10 : f32 to vector<8x128xf32>
    %45 = arith.maximumf %43, %44 : vector<8x128xf32>
    %46 = arith.truncf %45 : vector<8x128xf32> to vector<8x128xbf16>
    %cst_11 = arith.constant dense<0.000000e+00> : vector<8x128xf32>
    %47 = tpu.matmul %46, %39, %cst_11 {dimension_numbers = #tpu.dot_dimension_numbers<[1], [0], [0], [1], [0, 0, 1, 1], [], []>} : vector<8x128xbf16>, vector<128x128xbf16>, vector<8x128xf32> -> vector<8x128xf32>
    %48 = vector.broadcast %4 : vector<1x128xf32> to vector<8x128xf32>
    %49 = arith.addf %47, %48 : vector<8x128xf32>
    %c0_12 = arith.constant 0 : index
    %c0_13 = arith.constant 0 : index
    %50 = vector.load %arg4[%c0_12, %c0_13] : memref<8x128xf32, #tpu.memory_space<vmem>>, vector<8x128xf32>
    tpu.vector_store %arg4[%c0_12, %c0_13], %49 {strides = array<i32>} : memref<8x128xf32, #tpu.memory_space<vmem>>, vector<8x128xf32>,
    return
  }
  func.func @transform_0(%arg0: i32) -> (i32, i32) {
    %c0_i32 = arith.constant 0 : i32
    %c0_i32_0 = arith.constant 0 : i32
    return %arg0, %c0_i32 : i32, i32
  }
  func.func @transform_1(%arg0: i32) -> (i32, i32) {
    %c0_i32 = arith.constant 0 : i32
    %c0_i32_0 = arith.constant 0 : i32
    %c0_i32_1 = arith.constant 0 : i32
    return %c0_i32, %c0_i32_0 : i32, i32
  }
  func.func @transform_2(%arg0: i32) -> (i32, i32) {
    %c0_i32 = arith.constant 0 : i32
    %c0_i32_0 = arith.constant 0 : i32
    %c0_i32_1 = arith.constant 0 : i32
    return %c0_i32, %c0_i32_0 : i32, i32
  }
  func.func @transform_3(%arg0: i32) -> (i32, i32) {
    %c0_i32 = arith.constant 0 : i32
    %c0_i32_0 = arith.constant 0 : i32
    return %arg0, %c0_i32 : i32, i32
  }
}

</mosaic_0001>

<bundles_post_ra>
// kernel: net_forward.1
= control target key start
LH: loop header
LB: loop body
LE: loop exit
PB: predicated region body
PF: predicated region fallthrough
CT: control target
= control target key end

     0   :  { %8 = vsyncpa [#allocation3], 0  ;;  %s576_s0 = inlined_call_operand.hbm [shape: f32[8,5], index: 0, kind: input, shape index: {}]   ;;  %s577_s1 = inlined_call_operand.hbm [shape: bf16[256,128], index: 1, kind: input, shape index: {}]   ;;  %s578_s2 = inlined_call_operand.hbm [shape: f32[8,128], index: 2, kind: input, shape index: {}]   ;;  %s579_s3 = inlined_call_operand.vmem [shape: f32[8,128], index: 3, kind: output, shape index: {}]  }
   0x1   :  { %9 = vsyncpa [#allocation5], 0  ;;  %s514_s12 = smov [#allocation4]  }
   0x2   :  { %s25_s13 = sshll.u32 %s514_s12, 4  ;;  %s26_s13 = int_to_ptr.vmem [resolvable:$true] %s25_s13 }
   0x3   :  { %s458_s14 = scalar_lea.vmem %s26_s13, 2048  ;;  %p463_p1 = scmp.lt.s32.totalorder %s26_s13, %s26_s13 }
   0x4   :  { %p459_p0 = scmp.ne.s32.totalorder %s26_s13, %s458_s14  ;;  %p464_p2 = scmp.lt.s32.totalorder %s458_s14, %s458_s14 }
   0x6   :  { %p465_p3 = por %p464_p2, %p463_p1 }
   0x8   :  { %p466_p4 = pnand %p465_p3, %p459_p0 }
   0xa   :  { %469 = shalt.err (!%p466_p4)
}
   0xb   :  { %s515_s15 = smov 64   ;;  %s516_s16 = smov 4  }
   0xc   :  { %31 = dma.hbm_to_vmem [thread:$0]  %s577_s1, 2048, %s26_s13, [#allocation5], %s515_s15, %s515_s15, %s516_s16  }
   0xd   :  { %s517_s19 = smov [#allocation2]   ;;  %s518_s21 = smov [#allocation6]  }
   0xe   :  { %s16_s20 = sshll.u32 %s517_s19, 4  ;;  %s38_s22 = sshll.u32 %s518_s21, 4  ;;  %s17_s20 = int_to_ptr.vmem [resolvable:$true] %s16_s20  ;;  %s39_s22 = int_to_ptr.vmem [resolvable:$true] %s38_s22 }
   0xf   :  { %s478_s23 = scalar_lea.vmem %s17_s20, 128  ;;  %p483_p6 = scmp.lt.s32.totalorder %s17_s20, %s17_s20 }
  0x10   :  { %p479_p5 = scmp.ne.s32.totalorder %s17_s20, %s478_s23  ;;  %p484_p7 = scmp.lt.s32.totalorder %s478_s23, %s478_s23 }
  0x12   :  { %p485_p8 = por %p484_p7, %p483_p6 }
  0x14   :  { %p486_p9 = pnand %p485_p8, %p479_p5 }
  0x16   :  { %489 = shalt.err (!%p486_p9)
}
  0x17   :  { %19 = dma.hbm_to_vmem [thread:$0]  %s576_s0, 128, %s17_s20, [#allocation3]  }
  0x18   :  { %s498_s26 = scalar_lea.vmem %s39_s22, 128  ;;  %p503_p11 = scmp.lt.s32.totalorder %s39_s22, %s39_s22 }
  0x19   :  { %p499_p10 = scmp.ne.s32.totalorder %s39_s22, %s498_s26  ;;  %p504_p12 = scmp.lt.s32.totalorder %s498_s26, %s498_s26 }
  0x1b   :  { %p505_p13 = por %p504_p12, %p503_p11 }
  0x1d   :  { %p506_p0 = pnand %p505_p13, %p499_p10 }
  0x1f   :  { %509 = shalt.err (!%p506_p0)
}
  0x20   :  { %41 = dma.hbm_to_vmem [thread:$0]  %s578_s2, 128, %s39_s22, [#allocation5]  }
  0x21   :  { %510 = dma.done.wait [#allocation3], 128  }
  0x22   :  { %511 = vsyncadd [#allocation3], 4294967168 }
  0x23   :  { %512 = dma.done.wait [#allocation5], 2176  }
  0x24   :  { %513 = vsyncadd [#allocation5], 4294965120  ;;  %v519_v0 = vmov 0   ;;  %v520_v1 = vmov 2   ;;  %v521_v2 = vmov 0.0   ;;  %v52_v3 = vld [vmem:[#allocation2] sm:$0xff]  ;;  %v62_v21 = vlaneseq }
  0x25   :  { %428 = vset.pattern.permute.xlu0 %v519_v0  ;;  %430 = vset.pattern.permute.xlu1 %v520_v1  ;;  %v434_v4 = vld [vmem:[#allocation4 + $0x38] sm:$0xff]   ;;  %v435_v5 = vld [vmem:[#allocation4 + $0x30] sm:$0xff]   ;;  %v522_v6 = vmov 1   ;;  %v523_v7 = vmov 3   ;;  %v436_v8 = vld [vmem:[#allocation4 + $0x28] sm:$0xff]   ;;  %v524_v9 = vmov 4  }
  0x26   :  { %376 = vmatprep.subr.bf16.mxu0 %v521_v2  ;;  %396 = vmatprep.subr.bf16.mxu1 %v521_v2  ;;  %v437_v10 = vld [vmem:[#allocation4 + $0x20] sm:$0xff]   ;;  %v438_v11 = vld [vmem:[#allocation4 + $0x18] sm:$0xff]   ;;  %vm525_vm0 = vmmov 0   ;;  %v443_v13 = vld [vmem:[#allocation4 + $0x70] sm:$0xff]   ;;  %v63_v22 = vshrl.u32 %v62_v21, 7 }
  0x27   :  { %59 = vperm.xlu0 %428, %v52_v3   ;;  %83 = vperm.xlu1 %430, %v52_v3   ;;  %v442_v12 = vld [vmem:[#allocation4 + $0x78] sm:$0xff]   ;;  %v439_v14 = vld [vmem:[#allocation4 + $0x10] sm:$0xff]   ;;  %v444_v15 = vld [vmem:[#allocation4 + $0x68] sm:$0xff]  }
  0x28   :  { %377 = vmatpush3.bf16.msra.mxu0 %v434_v4  ;;  %392 = vmatprep.mubr.msk.bf16.mxu0 %vm525_vm0, %v521_v2  ;;  %v440_v16 = vld [vmem:[#allocation4 + $0x8] sm:$0xff]   ;;  %v445_v17 = vld [vmem:[#allocation4 + $0x60] sm:$0xff]   ;;  %v446_v19 = vld [vmem:[#allocation4 + $0x58] sm:$0xff]   ;;  %v64_v23 = vsub.s32 0, %v63_v22  ;;  %v78_v26 = vsub.s32 1, %v63_v22  ;;  %v88_v28 = vsub.s32 2, %v63_v22 }
  0x29   :  { %378 = vmatprep.subr.bf16.mxu0 %v521_v2  ;;  %412 = vmatprep.mubr.msk.bf16.mxu1 %vm525_vm0, %v521_v2  ;;  %v441_v18 = vld [vmem:[#allocation4] sm:$0xff]   ;;  %v447_v20 = vld [vmem:[#allocation4 + $0x50] sm:$0xff]   ;;  %v98_v32 = vsub.s32 3, %v63_v22  ;;  %v108_v34 = vsub.s32 4, %v63_v22  ;;  %v448_v52 = vld [vmem:[#allocation4 + $0x48] sm:$0xff]  }
  0x2a   :  { %397 = vmatpush3.bf16.msra.mxu1 %v442_v12  ;;  %v53_v24 = vld [vmem:[#allocation6] sm:$0x1f]  ;;  %v339_v33 = vld [vmem:[#allocation6 + $0x5] ss:$0 sm:$0xff]  ;;  %v340_v54 = vld [vmem:[#allocation6 + $0x6] ss:$0 sm:$0xff] }
  0x2b   :  { %429 = vset.pattern.permute.xlu0 %v522_v6  ;;  %431 = vset.pattern.permute.xlu1 %v523_v7  ;;  %v65_v25 = vrot.slane %v53_v24, %v64_v23  ;;  %v79_v31 = vrot.slane %v53_v24, %v78_v26  ;;  %v89_v35 = vrot.slane %v53_v24, %v88_v28  ;;  %v449_v53 = vld [vmem:[#allocation4 + $0x40] sm:$0xff]  }
  0x2c   :  { %73 = vperm.xlu0 %429, %v52_v3   ;;  %93 = vperm.xlu1 %431, %v52_v3   ;;  %v99_v40 = vrot.slane %v53_v24, %v98_v32  ;;  %v109_v41 = vrot.slane %v53_v24, %v108_v34  ;;  %v349_v62 = vld [vmem:[#allocation6 + $0x7] ss:$0 sm:$0xff] }
  0x2d   :  { %379 = vmatpush3.bf16.msra.mxu0 %v435_v5  ;;  %398 = vmatprep.subr.bf16.mxu1 %v521_v2 }
  0x2e   :  { %380 = vmatprep.subr.bf16.mxu0 %v521_v2  ;;  %399 = vmatpush3.bf16.msra.mxu1 %v443_v13 }
  0x2f   :  { %400 = vmatprep.subr.bf16.mxu1 %v521_v2 }
  0x30   :  { %432 = vset.pattern.permute.xlu1 %v524_v9  ;;  %433 = vset.pattern.permute.xlu0 %v524_v9 }
  0x31   :  { %103 = vperm.xlu1 %432, %v52_v3   ;;  %381 = vmatpush3.bf16.msra.mxu0 %v436_v8 }
  0x32   :  { %382 = vmatprep.subr.bf16.mxu0 %v521_v2  ;;  %401 = vmatpush3.bf16.msra.mxu1 %v444_v15 }
  0x33   :  { %402 = vmatprep.subr.bf16.mxu1 %v521_v2 }
  0x35   :  { %383 = vmatpush3.bf16.msra.mxu0 %v437_v10 }
  0x36   :  { %384 = vmatprep.subr.bf16.mxu0 %v521_v2  ;;  %403 = vmatpush3.bf16.msra.mxu1 %v445_v17 }
  0x37   :  { %404 = vmatprep.subr.bf16.mxu1 %v521_v2 }
  0x39   :  { %385 = vmatpush3.bf16.msra.mxu0 %v438_v11 }
  0x3a   :  { %386 = vmatprep.subr.bf16.mxu0 %v521_v2  ;;  %405 = vmatpush3.bf16.msra.mxu1 %v446_v19 }
  0x3b   :  { %406 = vmatprep.subr.bf16.mxu1 %v521_v2 }
  0x3d   :  { %387 = vmatpush3.bf16.msra.mxu0 %v439_v14 }
  0x3e   :  { %388 = vmatprep.subr.bf16.mxu0 %v521_v2  ;;  %407 = vmatpush3.bf16.msra.mxu1 %v447_v20 }
  0x3f   :  { %408 = vmatprep.subr.bf16.mxu1 %v521_v2 }
  0x41   :  { %389 = vmatpush3.bf16.msra.mxu0 %v440_v16 }
  0x42   :  { %390 = vmatprep.subr.bf16.mxu0 %v521_v2  ;;  %409 = vmatpush3.bf16.msra.mxu1 %v448_v52 }
  0x43   :  { %410 = vmatprep.subr.bf16.mxu1 %v521_v2 }
  0x45   :  { %391 = vmatpush3.bf16.msra.mxu0 %v441_v18 }
  0x46   :  { %411 = vmatpush3.bf16.msra.mxu1 %v449_v53 }
  0xa2   :  { %v60_v27 = vpop.permute.xlu0 %59  ;;  %v84_v29 = vpop.permute.xlu1 %83 }
  0xa3   :  { %v66_v30 = vmul.f32 %v65_v25, %v60_v27  ;;  %v90_v42 = vmul.f32 %v89_v35, %v84_v29 }
  0xa5   :  { %v71_v38 = vadd.f32 %v339_v33, %v66_v30 }
  0xa7   :  { %v74_v36 = vpop.permute.xlu0 %73  ;;  %v94_v37 = vpop.permute.xlu1 %93 }
  0xa8   :  { %v80_v39 = vmul.f32 %v79_v31, %v74_v36  ;;  %v100_v45 = vmul.f32 %v99_v40, %v94_v37 }
  0xaa   :  { %v81_v43 = vadd.f32 %v80_v39, %v71_v38 }
  0xac   :  { %v91_v44 = vadd.f32 %v90_v42, %v81_v43  ;;  %v104_v46 = vpop.permute.xlu1 %103 }
  0xad   :  { %v110_v47 = vmul.f32 %v109_v41, %v104_v46 }
  0xae   :  { %v101_v48 = vadd.f32 %v100_v45, %v91_v44 }
  0xb0   :  { %v111_v49 = vadd.f32 %v110_v47, %v101_v48 }
  0xb2   :  { %v112_v50 = vmax.f32 %v111_v49, 0.0 }
  0xb4   :  { %v145_v51 = vpack.c.bf16 %v112_v50, %v112_v50 }
  0xb6   :  { %393 = vmatmul.mubr.bf16.vlgmr.msra.gmra.mxu0 %v145_v51 }
 0x176   :  { %v232_v55 = vpop.f32.mrf.mxu0 }
 0x177   :  { %v233_v56 = vadd.f32 %v340_v54, %v232_v55 }
 0x178   :  { %v394_v57 = vpop.f32.mrf.mxu0 }
 0x179   :  { %v238_v58 = vmax.f32 %v233_v56, 0.0 }
 0x17a   :  { %v235_v59 = vpop.f32.mrf.mxu0 }
 0x17b   :  { %v239_v60 = vpack.c.bf16 %v238_v58, %v238_v58 }
 0x17c   :  { %v395_v61 = vpop.f32.mrf.mxu0 }
 0x17d   :  { %413 = vmatmul.mubr.bf16.vlgmr.msra.gmra.mxu1 %v239_v60 }
 0x23d   :  { %v326_v63 = vpop.f32.mrf.mxu1 }
 0x23e   :  { %v327_v0 = vadd.f32 %v349_v62, %v326_v63 }
 0x23f   :  { %v414_v1 = vpop.f32.mrf.mxu1 }
 0x240   :  { %332 = vst [vmem:[%s579_s3] sm:$0xff] %v327_v0 }
 0x241   :  { %v329_v2 = vpop.f32.mrf.mxu1 }
 0x243   :  { %v415_v3 = vpop.f32.mrf.mxu1 }
 0x244   :  { %337 = vsyncpa [#allocation3], 1 }
 0x245   :  { %338 = vsyncpa [#allocation5], 1 }

</bundles_post_ra>
